<compile_context>
chip_gen: v7x
topology: tpu7x:2x2x1
jax: 0.10.0
libtpu: 0.0.40
codegen_flags: <defaults>
</compile_context>

<pallas_src>
import functools
import math

import jax
import jax.numpy as jnp
from jax import lax
from jax.experimental import pallas as pl
from jax.experimental.pallas import tpu as pltpu


def _meta_projection_kernel(sqrt_c_ref, inv_sqrt_c_ref, x_ref, o_ref, *,
                            component_num, component_channel,
                            groups_per_block, aligned):
    # Block layout: x_ref / o_ref are (R, T) slices of the flattened (B*C, H*W)
    # tensor (channels/batches on sublanes, spatial positions on lanes) -- the
    # native NCHW memory order, no transposes anywhere.
    # sqrt_c_ref / inv_sqrt_c_ref live in SMEM: (component_num,) f32 scalars.
    cc = component_channel

    # Component id of the first channel group in this row block.  When each
    # block holds whole batches (groups_per_block % component_num == 0) this is
    # statically 0; only the rare C-tiled path needs the dynamic form.
    if groups_per_block % component_num == 0:
        comp_base = 0
    else:
        comp_base = (pl.program_id(0) * groups_per_block) % component_num

    def group_scaled(g):
        xi = x_ref[g * cc:(g + 1) * cc, :]                       # (cc, T) native dtype
        # Narrow (1, T) f32 column: squared norm (f32 accumulate), rsqrt,
        # clamp, artanh, curvature scale.  No wide divides, no wide f32 copy.
        sq = jnp.sum(xi * xi, axis=0, keepdims=True, dtype=jnp.float32)
        sq = jnp.maximum(sq, 1e-30)                              # norm clamp_min(1e-15)^2
        inv_norm = lax.rsqrt(sq)
        norm = sq * inv_norm
        comp = (comp_base + g) % component_num
        sc = sqrt_c_ref[comp]
        isc = inv_sqrt_c_ref[comp]
        # arg >= 0 always, so only the upper clamp of hyptorch's clip matters.
        arg = jnp.minimum(sc * norm, 1.0 - 1e-5)
        atanh = 0.5 * jnp.log((1.0 + arg) / (1.0 - arg))
        factor = (atanh * isc) * inv_norm                        # (1, T) f32
        return xi * factor.astype(xi.dtype)                      # wide mul in input dtype

    if aligned:
        # Group boundaries land on sublane register tiles: per-group slice
        # loads/stores are fully dense.
        for g in range(groups_per_block):
            o_ref[g * cc:(g + 1) * cc, :] = group_scaled(g).astype(o_ref.dtype)
    else:
        # Misaligned component_channel: build the whole tile in registers and do
        # ONE dense full-tile store (no masked read-modify-write stores).
        parts = [group_scaled(g) for g in range(groups_per_block)]
        out = parts[0] if len(parts) == 1 else jnp.concatenate(parts, axis=0)
        o_ref[...] = out.astype(o_ref.dtype)


def _vmem_capacity_bytes():
    try:
        cap = getattr(pltpu.get_tpu_info(), "vmem_capacity_bytes", None)
        if cap:
            return int(cap)
    except Exception:
        pass
    return 64 * 1024 * 1024  # conservative default (v7x per-TensorCore VMEM)


def _pick_blocks(B, C, HW, itemsize, cc, budget_bytes):
    """Pick (R, tile_hw): R rows per block over the flattened (B*C) axis (always
    a multiple of the group size cc) and a lane tile over H*W, sized so that the
    double-buffered in+out blocks plus f32 column temporaries fit the budget."""
    component_num = C // cc
    sub = max(8, 32 // itemsize)            # sublane register tile for this dtype
    per_elem = 4 * itemsize + 8             # dbl-buffered in+out + f32 temps headroom
    BC = B * C

    # Lane tile: largest 128-multiple divisor of HW whose full-C block fits the
    # budget; non-128-aligned HW must take the full extent.
    if HW % 128 == 0:
        tile_hw = min(HW, 2048)
        while tile_hw > 128 and C * tile_hw * per_elem > budget_bytes:
            tile_hw -= 128
        while HW % tile_hw:
            tile_hw -= 128
    else:
        tile_hw = HW

    if C * tile_hw * per_elem <= budget_bytes:
        # Full-C blocks fit: fold whole batches into the row block to amortize
        # per-grid-step overhead (one large contiguous DMA per step).
        bound = min(B,
                    max(1, budget_bytes // (C * tile_hw * per_elem)),
                    max(1, 128 // component_num))   # bound the unrolled group loop
        bblk = None
        for cand in range(max(1, bound), 0, -1):
            if B % cand == 0 and ((cand * C) % 8 == 0 or cand == B):
                bblk = cand
                break
        if bblk is None:
            bblk = B                                # full row extent is always legal
        R = bblk * C
    else:
        # A single full-C block busts the budget (large C x non-aligned HW):
        # tile the channel axis, keeping groups whole and sublane-aligned.
        unit = (cc * sub) // math.gcd(cc, sub)
        R = None
        for k in range(C // unit, 0, -1):
            cand = k * unit
            if C % cand == 0 and cand * tile_hw * per_elem <= budget_bytes:
                R = cand
                break
        if R is None:                               # best-effort legal fallback
            R = C if (C % 8 == 0 or B == 1) else BC

    # Prefer >= 2 grid steps so a 2-TensorCore chip (v7x) can split the work.
    if (BC // R) * (HW // tile_hw) == 1:
        if R == BC and B > 1:
            for cand in range(B // 2, 0, -1):
                if B % cand == 0 and (cand * C) % 8 == 0:
                    R = cand * C
                    break
        if (BC // R) * (HW // tile_hw) == 1 and HW % 256 == 0:
            tile_hw //= 2
            while HW % tile_hw:
                tile_hw -= 128

    return R, tile_hw


def meta_projection(x, curvature, component_num):
    """x: (B, C, H, W) NCHW (PyTorch convention). curvature: (component_num,)."""
    B, C, H, W = x.shape
    assert C % component_num == 0
    assert curvature.shape == (component_num,)
    cc = C // component_num
    HW = H * W
    itemsize = x.dtype.itemsize
    sub = max(8, 32 // itemsize)

    cap = _vmem_capacity_bytes()
    budget = max(4 * 1024 * 1024, cap // 4)
    R, tile_hw = _pick_blocks(B, C, HW, itemsize, cc, budget)
    groups_per_block = R // cc
    aligned = (cc % sub == 0)

    # Free reshape (adjacent dims collapse) -- data stays in NCHW order.
    x2 = x.reshape(B * C, HW)

    # Hoist sqrt(curvature) / 1/sqrt(curvature) out of the kernel.
    sqrt_c = jnp.sqrt(curvature.astype(jnp.float32))
    inv_sqrt_c = 1.0 / sqrt_c

    kernel = functools.partial(
        _meta_projection_kernel,
        component_num=component_num,
        component_channel=cc,
        groups_per_block=groups_per_block,
        aligned=aligned,
    )

    per_elem = 4 * itemsize + 8
    vmem_limit = int(min(cap, max(cap // 2, 2 * R * tile_hw * per_elem)))

    grid = ((B * C) // R, HW // tile_hw)
    block = (R, tile_hw)

    out2 = pl.pallas_call(
        kernel,
        out_shape=jax.ShapeDtypeStruct((B * C, HW), x.dtype),
        grid=grid,
        in_specs=[
            pl.BlockSpec(memory_space=pltpu.MemorySpace.SMEM),   # sqrt(curvature)
            pl.BlockSpec(memory_space=pltpu.MemorySpace.SMEM),   # 1/sqrt(curvature)
            pl.BlockSpec(block, lambda r, t: (r, t)),
        ],
        out_specs=pl.BlockSpec(block, lambda r, t: (r, t)),
        compiler_params=pltpu.CompilerParams(
            dimension_semantics=("parallel", "parallel"),
            vmem_limit_bytes=vmem_limit,
        ),
    )(sqrt_c, inv_sqrt_c, x2)

    # Free reshape back to NCHW.
    return out2.reshape(B, C, H, W)


def meta_projection_ref(x, curvature, component_num):
    """Pure-JAX reference mirroring the PyTorch forward literally."""
    B, C, H, W = x.shape
    cc = C // component_num
    outs = []
    for i in range(component_num):
        xi = x[:, i * cc:(i + 1) * cc]                                # index_select on dim 1
        v = jnp.transpose(xi, (0, 3, 2, 1)).reshape(B * W * H, cc)    # transpose(1,3).view
        sqrt_c = jnp.sqrt(curvature[i])
        norm = jnp.maximum(jnp.sqrt(jnp.sum(v * v, axis=-1, keepdims=True)), 1e-15)
        arg = jnp.clip(sqrt_c * norm, -1.0 + 1e-5, 1.0 - 1e-5)
        res = v / norm / sqrt_c * jnp.arctanh(arg)
        outs.append(jnp.transpose(res.reshape(B, W, H, cc), (0, 3, 2, 1)))
    return jnp.concatenate(outs, axis=1)


if __name__ == "__main__":
    key = jax.random.PRNGKey(0)
    k1, k2 = jax.random.split(key)

    # Case 1: spec shape -- misaligned component_channel (cc=2) exercises the
    # single-dense-store path.
    B, C, H, W = 2, 4, 16, 16
    component_num = 2
    x = 0.1 * jax.random.normal(k1, (B, C, H, W), dtype=jnp.float32)
    curvature = jnp.array([0.5, 1.0], dtype=jnp.float32)
    out = jax.block_until_ready(meta_projection(x, curvature, component_num))
    ref = meta_projection_ref(x, curvature, component_num)
    assert out.shape == (B, C, H, W)
    assert jnp.allclose(out, ref, atol=1e-5, rtol=1e-5), "Pallas mismatch (misaligned cc)"

    # Case 2: sublane-aligned component_channel (cc=8) exercises the per-group
    # slice path and batch folding.
    B2, C2, H2, W2 = 2, 16, 8, 8
    x2 = 0.1 * jax.random.normal(k2, (B2, C2, H2, W2), dtype=jnp.float32)
    out2 = jax.block_until_ready(meta_projection(x2, curvature, component_num))
    ref2 = meta_projection_ref(x2, curvature, component_num)
    assert jnp.allclose(out2, ref2, atol=1e-5, rtol=1e-5), "Pallas mismatch (aligned cc)"

    print("KERNEL_OK")
</pallas_src>

<mosaic_0001>
module attributes {stable_mosaic.version = 11 : i64} {
  func.func @_meta_projection_kernel(%arg0: i32, %arg1: i32, %arg2: memref<2xf32, #tpu.memory_space<smem>>, %arg3: memref<2xf32, #tpu.memory_space<smem>>, %arg4: memref<8x128xf32, #tpu.memory_space<vmem>>, %arg5: memref<8x128xf32, #tpu.memory_space<vmem>>) attributes {dimension_semantics = [#tpu.dimension_semantics<parallel>, #tpu.dimension_semantics<parallel>], iteration_bounds = array<i64: 1, 2>, scalar_prefetch = 0 : i64, scratch_operands = 0 : i64, tpu.core_type = #tpu.core_type<tc>, window_params = [{transform_indices = @transform_0, window_bounds = array<i64: 2>}, {transform_indices = @transform_1, window_bounds = array<i64: 2>}, {transform_indices = @transform_2, window_bounds = array<i64: 8, 128>}, {transform_indices = @transform_3, window_bounds = array<i64: 8, 128>}]} {
    %c0 = arith.constant 0 : index
    %c0_0 = arith.constant 0 : index
    %0 = vector.load %arg4[%c0, %c0_0] : memref<8x128xf32, #tpu.memory_space<vmem>>, vector<2x128xf32>
    %1 = arith.mulf %0, %0 : vector<2x128xf32>
    %cst = arith.constant dense<0.000000e+00> : vector<128xf32>
    %2 = vector.multi_reduction <add>, %1, %cst [0] : vector<2x128xf32> to vector<128xf32>
    %3 = vector.shape_cast %2 : vector<128xf32> to vector<1x128xf32>
    %cst_1 = arith.constant 1.000000e-30 : f32
    %4 = vector.broadcast %cst_1 : f32 to vector<1x128xf32>
    %5 = arith.maximumf %3, %4 : vector<1x128xf32>
    %6 = math.rsqrt %5 : vector<1x128xf32>
    %7 = arith.mulf %5, %6 : vector<1x128xf32>
    %c0_2 = arith.constant 0 : index
    %8 = memref.load %arg2[%c0_2] : memref<2xf32, #tpu.memory_space<smem>>
    %c0_3 = arith.constant 0 : index
    %9 = memref.load %arg3[%c0_3] : memref<2xf32, #tpu.memory_space<smem>>
    %10 = vector.broadcast %8 : f32 to vector<1x128xf32>
    %11 = arith.mulf %10, %7 : vector<1x128xf32>
    %cst_4 = arith.constant 0.999989986 : f32
    %12 = vector.broadcast %cst_4 : f32 to vector<1x128xf32>
    %13 = arith.minimumf %11, %12 : vector<1x128xf32>
    %cst_5 = arith.constant 1.000000e+00 : f32
    %14 = vector.broadcast %cst_5 : f32 to vector<1x128xf32>
    %15 = arith.addf %14, %13 : vector<1x128xf32>
    %cst_6 = arith.constant 1.000000e+00 : f32
    %16 = vector.broadcast %cst_6 : f32 to vector<1x128xf32>
    %17 = arith.subf %16, %13 : vector<1x128xf32>
    %18 = arith.divf %15, %17 : vector<1x128xf32>
    %19 = math.log %18 : vector<1x128xf32>
    %cst_7 = arith.constant 5.000000e-01 : f32
    %20 = vector.broadcast %cst_7 : f32 to vector<1x128xf32>
    %21 = arith.mulf %20, %19 : vector<1x128xf32>
    %22 = vector.broadcast %9 : f32 to vector<1x128xf32>
    %23 = arith.mulf %21, %22 : vector<1x128xf32>
    %24 = arith.mulf %23, %6 : vector<1x128xf32>
    %25 = vector.broadcast %24 : vector<1x128xf32> to vector<2x128xf32>
    %26 = arith.mulf %0, %25 : vector<2x128xf32>
    %c2 = arith.constant 2 : index
    %c0_8 = arith.constant 0 : index
    %27 = vector.load %arg4[%c2, %c0_8] : memref<8x128xf32, #tpu.memory_space<vmem>>, vector<2x128xf32>
    %28 = arith.mulf %27, %27 : vector<2x128xf32>
    %cst_9 = arith.constant dense<0.000000e+00> : vector<128xf32>
    %29 = vector.multi_reduction <add>, %28, %cst_9 [0] : vector<2x128xf32> to vector<128xf32>
    %30 = vector.shape_cast %29 : vector<128xf32> to vector<1x128xf32>
    %cst_10 = arith.constant 1.000000e-30 : f32
    %31 = vector.broadcast %cst_10 : f32 to vector<1x128xf32>
    %32 = arith.maximumf %30, %31 : vector<1x128xf32>
    %33 = math.rsqrt %32 : vector<1x128xf32>
    %34 = arith.mulf %32, %33 : vector<1x128xf32>
    %c1 = arith.constant 1 : index
    %35 = memref.load %arg2[%c1] : memref<2xf32, #tpu.memory_space<smem>>
    %c1_11 = arith.constant 1 : index
    %36 = memref.load %arg3[%c1_11] : memref<2xf32, #tpu.memory_space<smem>>
    %37 = vector.broadcast %35 : f32 to vector<1x128xf32>
    %38 = arith.mulf %37, %34 : vector<1x128xf32>
    %cst_12 = arith.constant 0.999989986 : f32
    %39 = vector.broadcast %cst_12 : f32 to vector<1x128xf32>
    %40 = arith.minimumf %38, %39 : vector<1x128xf32>
    %cst_13 = arith.constant 1.000000e+00 : f32
    %41 = vector.broadcast %cst_13 : f32 to vector<1x128xf32>
    %42 = arith.addf %41, %40 : vector<1x128xf32>
    %cst_14 = arith.constant 1.000000e+00 : f32
    %43 = vector.broadcast %cst_14 : f32 to vector<1x128xf32>
    %44 = arith.subf %43, %40 : vector<1x128xf32>
    %45 = arith.divf %42, %44 : vector<1x128xf32>
    %46 = math.log %45 : vector<1x128xf32>
    %cst_15 = arith.constant 5.000000e-01 : f32
    %47 = vector.broadcast %cst_15 : f32 to vector<1x128xf32>
    %48 = arith.mulf %47, %46 : vector<1x128xf32>
    %49 = vector.broadcast %36 : f32 to vector<1x128xf32>
    %50 = arith.mulf %48, %49 : vector<1x128xf32>
    %51 = arith.mulf %50, %33 : vector<1x128xf32>
    %52 = vector.broadcast %51 : vector<1x128xf32> to vector<2x128xf32>
    %53 = arith.mulf %27, %52 : vector<2x128xf32>
    %c4 = arith.constant 4 : index
    %c0_16 = arith.constant 0 : index
    %54 = vector.load %arg4[%c4, %c0_16] : memref<8x128xf32, #tpu.memory_space<vmem>>, vector<2x128xf32>
    %55 = arith.mulf %54, %54 : vector<2x128xf32>
    %cst_17 = arith.constant dense<0.000000e+00> : vector<128xf32>
    %56 = vector.multi_reduction <add>, %55, %cst_17 [0] : vector<2x128xf32> to vector<128xf32>
    %57 = vector.shape_cast %56 : vector<128xf32> to vector<1x128xf32>
    %cst_18 = arith.constant 1.000000e-30 : f32
    %58 = vector.broadcast %cst_18 : f32 to vector<1x128xf32>
    %59 = arith.maximumf %57, %58 : vector<1x128xf32>
    %60 = math.rsqrt %59 : vector<1x128xf32>
    %61 = arith.mulf %59, %60 : vector<1x128xf32>
    %c0_19 = arith.constant 0 : index
    %62 = memref.load %arg2[%c0_19] : memref<2xf32, #tpu.memory_space<smem>>
    %c0_20 = arith.constant 0 : index
    %63 = memref.load %arg3[%c0_20] : memref<2xf32, #tpu.memory_space<smem>>
    %64 = vector.broadcast %62 : f32 to vector<1x128xf32>
    %65 = arith.mulf %64, %61 : vector<1x128xf32>
    %cst_21 = arith.constant 0.999989986 : f32
    %66 = vector.broadcast %cst_21 : f32 to vector<1x128xf32>
    %67 = arith.minimumf %65, %66 : vector<1x128xf32>
    %cst_22 = arith.constant 1.000000e+00 : f32
    %68 = vector.broadcast %cst_22 : f32 to vector<1x128xf32>
    %69 = arith.addf %68, %67 : vector<1x128xf32>
    %cst_23 = arith.constant 1.000000e+00 : f32
    %70 = vector.broadcast %cst_23 : f32 to vector<1x128xf32>
    %71 = arith.subf %70, %67 : vector<1x128xf32>
    %72 = arith.divf %69, %71 : vector<1x128xf32>
    %73 = math.log %72 : vector<1x128xf32>
    %cst_24 = arith.constant 5.000000e-01 : f32
    %74 = vector.broadcast %cst_24 : f32 to vector<1x128xf32>
    %75 = arith.mulf %74, %73 : vector<1x128xf32>
    %76 = vector.broadcast %63 : f32 to vector<1x128xf32>
    %77 = arith.mulf %75, %76 : vector<1x128xf32>
    %78 = arith.mulf %77, %60 : vector<1x128xf32>
    %79 = vector.broadcast %78 : vector<1x128xf32> to vector<2x128xf32>
    %80 = arith.mulf %54, %79 : vector<2x128xf32>
    %c6 = arith.constant 6 : index
    %c0_25 = arith.constant 0 : index
    %81 = vector.load %arg4[%c6, %c0_25] : memref<8x128xf32, #tpu.memory_space<vmem>>, vector<2x128xf32>
    %82 = arith.mulf %81, %81 : vector<2x128xf32>
    %cst_26 = arith.constant dense<0.000000e+00> : vector<128xf32>
    %83 = vector.multi_reduction <add>, %82, %cst_26 [0] : vector<2x128xf32> to vector<128xf32>
    %84 = vector.shape_cast %83 : vector<128xf32> to vector<1x128xf32>
    %cst_27 = arith.constant 1.000000e-30 : f32
    %85 = vector.broadcast %cst_27 : f32 to vector<1x128xf32>
    %86 = arith.maximumf %84, %85 : vector<1x128xf32>
    %87 = math.rsqrt %86 : vector<1x128xf32>
    %88 = arith.mulf %86, %87 : vector<1x128xf32>
    %c1_28 = arith.constant 1 : index
    %89 = memref.load %arg2[%c1_28] : memref<2xf32, #tpu.memory_space<smem>>
    %c1_29 = arith.constant 1 : index
    %90 = memref.load %arg3[%c1_29] : memref<2xf32, #tpu.memory_space<smem>>
    %91 = vector.broadcast %89 : f32 to vector<1x128xf32>
    %92 = arith.mulf %91, %88 : vector<1x128xf32>
    %cst_30 = arith.constant 0.999989986 : f32
    %93 = vector.broadcast %cst_30 : f32 to vector<1x128xf32>
    %94 = arith.minimumf %92, %93 : vector<1x128xf32>
    %cst_31 = arith.constant 1.000000e+00 : f32
    %95 = vector.broadcast %cst_31 : f32 to vector<1x128xf32>
    %96 = arith.addf %95, %94 : vector<1x128xf32>
    %cst_32 = arith.constant 1.000000e+00 : f32
    %97 = vector.broadcast %cst_32 : f32 to vector<1x128xf32>
    %98 = arith.subf %97, %94 : vector<1x128xf32>
    %99 = arith.divf %96, %98 : vector<1x128xf32>
    %100 = math.log %99 : vector<1x128xf32>
    %cst_33 = arith.constant 5.000000e-01 : f32
    %101 = vector.broadcast %cst_33 : f32 to vector<1x128xf32>
    %102 = arith.mulf %101, %100 : vector<1x128xf32>
    %103 = vector.broadcast %90 : f32 to vector<1x128xf32>
    %104 = arith.mulf %102, %103 : vector<1x128xf32>
    %105 = arith.mulf %104, %87 : vector<1x128xf32>
    %106 = vector.broadcast %105 : vector<1x128xf32> to vector<2x128xf32>
    %107 = arith.mulf %81, %106 : vector<2x128xf32>
    %108 = tpu.concatenate %26, %53, %80, %107 in 0 : vector<2x128xf32>, vector<2x128xf32>, vector<2x128xf32>, vector<2x128xf32> -> vector<8x128xf32>
    %c0_34 = arith.constant 0 : index
    %c0_35 = arith.constant 0 : index
    %109 = vector.load %arg5[%c0_34, %c0_35] : memref<8x128xf32, #tpu.memory_space<vmem>>, vector<8x128xf32>
    tpu.vector_store %arg5[%c0_34, %c0_35], %108 {strides = array<i32>} : memref<8x128xf32, #tpu.memory_space<vmem>>, vector<8x128xf32>,
    return
  }
  func.func @transform_0(%arg0: i32, %arg1: i32) -> i32 {
    %c0_i32 = arith.constant 0 : i32
    %c0_i32_0 = arith.constant 0 : i32
    return %c0_i32 : i32
  }
  func.func @transform_1(%arg0: i32, %arg1: i32) -> i32 {
    %c0_i32 = arith.constant 0 : i32
    %c0_i32_0 = arith.constant 0 : i32
    return %c0_i32 : i32
  }
  func.func @transform_2(%arg0: i32, %arg1: i32) -> (i32, i32) {
    %c0_i32 = arith.constant 0 : i32
    return %arg0, %arg1 : i32, i32
  }
  func.func @transform_3(%arg0: i32, %arg1: i32) -> (i32, i32) {
    %c0_i32 = arith.constant 0 : i32
    return %arg0, %arg1 : i32, i32
  }
}

</mosaic_0001>

<bundles_post_ra>
// kernel: tpu_custom_call.1
= control target key start
LH: loop header
LB: loop body
LE: loop exit
PB: predicated region body
PF: predicated region fallthrough
CT: control target
= control target key end

     0   :  { %8 = vsyncpa [#allocation5], 0  ;;  %s1023_s0 = inlined_call_operand.hbm [shape: f32[2], index: 0, kind: input, shape index: {}]   ;;  %s1024_s1 = inlined_call_operand.vmem [shape: f32[2], index: 1, kind: input, shape index: {}]   ;;  %s1025_s2 = inlined_call_operand.hbm [shape: f32[8,256], index: 2, kind: input, shape index: {}]   ;;  %s1026_s3 = inlined_call_operand.hbm [shape: f32[8,256], index: 3, kind: output, shape index: {}]  }
   0x1   :  { %9 = vsyncpa [#allocation6], 0 }
   0x2   :  { %10 = vsyncpa [#allocation3], 0 }
   0x3   :  { %12 = vsyncpa [#allocation3 + $0x1], 0 }
   0x4   :  { %13 = vsyncpa [#allocation4], 0 }
   0x5   :  { %15 = vsyncpa [#allocation4 + $0x1], 0  ;;  %s771_s12 = smov 0   ;;  %s773_s13 = smov 0  }
   0x6   :  { %s775_s14 = smov 0   ;;  %s777_s15 = smov 0  }
   0x7   :  { %s779_s16 = smov 0   ;;  %s781_s17 = smov 0  }
   0x8 LB: > { %s471_s18 = sadd.s32 4294967295, %s745_s17   ;;  %s472_s19 = sadd.s32 4294967294, %s745_s17   ;;  %s745_s17 = sphi %s781_s17, %s21_s17   ;;  %s741_s16 = sphi %s779_s16, %s1049_s16   ;;  %s737_s15 = sphi %s777_s15, %s1048_s15   ;;  %s733_s14 = sphi %s775_s14, %s1047_s14   ;;  %s729_s13 = sphi %s773_s13, %s1046_s13   ;;  %s725_s12 = sphi %s771_s12, %s1045_s12  }
   0x9   : > { %p97_p0 = scmp.ne.s32.totalorder %s729_s13, %s725_s12  ;;  %p805_p1 = scmp.eq.s32.totalorder %s471_s18, 0 }
   0xa   : > { %p809_p2 = scmp.eq.s32.totalorder %s471_s18, 1  ;;  %p129_p3 = scmp.eq.s32.totalorder %s472_s19, 1 }
   0xb   : > { %s1031_s20 = scalar_select %p805_p1, 1, 0 }
   0xc   : > { %p815_p4 = por %p805_p1, %p97_p0  ;;  %p473_p5 = scmp.ge.s32.totalorder %s745_s17, 1 }
   0xd   : > { %p820_p6 = por %p129_p3, %p97_p0  ;;  %p136_p7 = scmp.lt.s32.totalorder %s745_s17, 3 }
   0xe   : > { %s1033_s22 = scalar_select %p815_p4, 1, 0 }
   0xf   : > { %s1034_s23 = scalar_select %p820_p6, 1, 0 }
  0x10   : > { %p825_p8 = pnand %p473_p5, %p136_p7  ;;  %s158_s27 = sshll.u32 %s1024_s1, 4  ;;  %s159_s27 = int_to_ptr.vmem [resolvable:$true] %s158_s27 }
  0x11   : > { %s30_s29 = sadd.s32 1, %s741_s16  ;;  %s597_s6 = scalar_lea.hbm %s1023_s0, 16 }
  0x12   : > { %s1035_s24 = scalar_select %p825_p8, 1, 0 }
  0x13   : > { %p502_p10 = pneg %p825_p8  ;;  %p842_p12 = scmp.ge.s32.totalorder %s30_s29, 2 }
  0x14   : > { %p598_p13 = scmp.ne.s32.totalorder %s1023_s0, %s597_s6  ;;  %p604_p7 = scmp.lt.u32.totalorder %s597_s6, %s1023_s0 }
  0x15   : > { %p837_p11 = pnand %p502_p10, %p805_p1 }
  0x17   : > { %p599_p0 = pneg %p837_p11 }
  0x19   : > { %p600_p3 = pnand %p599_p0, %p598_p13 }
  0x1b   : > { %p601_p5 = pneg %p600_p3 }
  0x1d   : > { %p606_p10 = pnand %p604_p7, %p601_p5 }
  0x1f   : > { %609 = shalt.err (!%p606_p10)
}
  0x20   : > { %s747_s11 = smov [#allocation2]   ;;  %s610_s25 = scalar_lea.vmem %s159_s27, 16 }
  0x21   : > { %505 = dma.hbm_to_smem (!%p837_p11), %s1023_s0, 16, %s747_s11, [#allocation5]  }
  0x22   : > { %p611_p9 = scmp.ne.s32.totalorder %s159_s27, %s610_s25  ;;  %p618_p1 = scmp.lt.s32.totalorder %s159_s27, %s159_s27 }
  0x23   : > { %p619_p13 = scmp.lt.s32.totalorder %s610_s25, %s610_s25 }
  0x24   : > { %p613_p6 = pnand %p611_p9, %p599_p0 }
  0x25   : > { %p620_p3 = por %p619_p13, %p618_p1 }
  0x26   : > { %p614_p4 = pneg %p613_p6 }
  0x28   : > { %p621_p8 = pnand %p620_p3, %p614_p4 }
  0x2a   : > { %624 = shalt.err (!%p621_p8)
}
  0x2b   : > { %s748_s26 = smov [#allocation7]   ;;  %s1051_s29 = smov (%p842_p12, %s30_s29), 0 }
  0x2c   : > { %508 = dma.vmem_to_smem (!%p837_p11), %s159_s27, 16, %s748_s26, [#allocation6]  }
  0x2d   : > { %s84_s4 = sadd.s32 1, %s733_s14  ;;  %p91_p1 = scmp.ne.s32.totalorder %s733_s14, %s729_s13 }
  0x2e   : > { %s80_s5 = ssub.s32 %s741_s16, %s1051_s29  ;;  %p92_p4 = scmp.eq.s32.totalorder %s745_s17, 0 }
  0x2f   : > { %p82_p6 = scmp.eq.s32.totalorder %s80_s5, 0  ;;  %p876_p8 = por %p809_p2, %p91_p1 }
  0x30   : > { %p93_p9 = por %p92_p4, %p91_p1  ;;  %p519_p0 = scmp.lt.s32.totalorder %s745_s17, 2 }
  0x31   : > { %s882_s6 = scalar_select %p82_p6, %s733_s14, %s84_s4  }
  0x32   : > { %s169_s7 = sand.u32 1, %s733_s14   ;;  %s478_s27 = sshll.u32 %s741_s16, 7 }
  0x33   : > { %s477_s30 = sshll.u32 %s169_s7, 3  ;;  %s889_s10 = scalar_lea.hbm %s1025_s2, %s478_s27 }
  0x34   : > { %s173_s21 = scalar_lea.vmem [#allocation8], %s477_s30  ;;  %p891_p2 = pnand %p519_p0, %p93_p9 }
  0x35   : > { %s182_s11 = sshll.u32 %s173_s21, 4  ;;  %s170_s19 = scalar_lea.sflag [#allocation3], %s169_s7  ;;  %s895_s11 = int_to_ptr.vmem [resolvable:$true] %s182_s11 }
  0x36   : > { %s625_s25 = scalar_lea.hbm %s889_s10, 128  ;;  %p627_p12 = pneg %p891_p2 }
  0x37   : > { %p626_p11 = scmp.ne.s32.totalorder %s889_s10, %s625_s25  ;;  %s630_s5 = scalar_lea.hbm %s1025_s2, 256 }
  0x38   : > { %p631_p10 = scmp.lt.u32.totalorder %s889_s10, %s1025_s2  ;;  %p632_p13 = scmp.lt.u32.totalorder %s630_s5, %s625_s25 }
  0x39   : > { %p628_p5 = pnand %p627_p12, %p626_p11  ;;  %p634_p1 = scmp.lt.u32.totalorder %s625_s25, %s889_s10 }
  0x3a   : > { %p633_p3 = por %p632_p13, %p631_p10 }
  0x3b   : > { %p629_p7 = pneg %p628_p5 }
  0x3c   : > { %p635_p4 = por %p634_p1, %p633_p3 }
  0x3e   : > { %p636_p6 = pnand %p635_p4, %p629_p7 }
  0x40   : > { %639 = shalt.err (!%p636_p6)
}
  0x41   : > { %s640_s7 = scalar_lea.vmem %s895_s11, 128  ;;  %s749_s8 = smov [#allocation8]  }
  0x42   : > { %p641_p9 = scmp.ne.s32.totalorder %s895_s11, %s640_s7  ;;  %s645_s9 = sshll.u32 %s749_s8, 4  ;;  %s646_s9 = int_to_ptr.vmem [resolvable:$false] %s645_s9 }
  0x43   : > { %s647_s21 = scalar_lea.vmem %s646_s9, 256  ;;  %p648_p5 = scmp.lt.s32.totalorder %s895_s11, %s646_s9 }
  0x44   : > { %p643_p0 = pnand %p641_p9, %p627_p12  ;;  %p649_p10 = scmp.lt.s32.totalorder %s647_s21, %s640_s7 }
  0x46   : > { %p644_p11 = pneg %p643_p0  ;;  %p650_p13 = por %p649_p10, %p648_p5 }
  0x48   : > { %p651_p3 = pnand %p650_p13, %p644_p11 }
  0x4a   : > { %654 = shalt.err (!%p651_p3)
}
  0x4b   : > { %512 = dma.hbm_to_vmem [thread:$0]  (!%p891_p2), %s889_s10, 128, %s895_s11, %s170_s19  }
  0x4c   : > { %p1040_p7 = scmp.ne.s32.totalorder %s1035_s24, 0 }
  0x4d   : > { %p1041_p12 = scmp.ne.s32.totalorder (!%p1040_p7), %s1031_s20, 0 }
  0x4e   : > { %191 = sbr.rel (%p1040_p7) target bundleno = 185 (0xb9), region = 32 }
  0x55   : > { %708 = dma.done.wait (%p1041_p12), [#allocation5], 16  }
  0x56   : > { %710 = vsyncadd (%p1041_p12), [#allocation5], 4294967280 }
  0x57   : > { %712 = dma.done.wait (%p1041_p12), [#allocation6], 16  }
  0x58   : > { %714 = vsyncadd (%p1041_p12), [#allocation6], 4294967280  ;;  %s933_s18 = sand.u32 1, %s729_s13   ;;  %p1042_p2 = scmp.ne.s32.totalorder %s1033_s22, 0 }
  0x59   : > { %s482_s24 = sshll.u32 %s933_s18, 3  ;;  %s202_s10 = scalar_lea.sflag [#allocation3], %s933_s18 }
  0x5a   : > { %s205_s11 = scalar_lea.vmem [#allocation8], %s482_s24 }
  0x5b   : > { %716 = dma.done.wait (%p1042_p2), %s202_s10, 128  }
  0x5c   : > { %718 = vsyncadd (%p1042_p2), %s202_s10, 4294967168 }
  0x5d   : > { %210 = sfence }
  0x5e   : > { %v943_v0 = vld [vmem:[%s205_s11] sm:$0x3]  ;;  %vm231_vm0 = vcmask 1041408   ;;  %v947_v2 = vld [vmem:[%s205_s11 + $0x2] sm:$0x3]  ;;  %s242_s20 = sld [smem:[#allocation2]] }
  0x5f   : > { %v230_v1 = vmul.f32 %v943_v0, %v943_v0  ;;  %v259_v3 = vmul.f32 %v947_v2, %v947_v2  ;;  %v951_v4 = vld [vmem:[%s205_s11 + $0x4] sm:$0x3]  ;;  %v953_v5 = vld [vmem:[%s205_s11 + $0x6] sm:$0x3]  ;;  %s484_s22 = sld [smem:[#allocation2 + $0x1]]  ;;  %s243_s19 = sld [smem:[#allocation7]] }
  0x60   : > { %v287_v7 = vmul.f32 %v951_v4, %v951_v4  ;;  %v311_v8 = vmul.f32 %v953_v5, %v953_v5  ;;  %s485_s25 = sld [smem:[#allocation7 + $0x1]]  ;;  %vm344_vm1 = vcmask 1043456   ;;  %s228_s26 = scalar_lea.vmem [#allocation9], %s482_s24  ;;  %vm346_vm2 = vcmask 1045504  }
  0x61   : > { %v232_v6 = vsel %vm231_vm0, %v230_v1, 0.0  ;;  %v260_v10 = vsel %vm231_vm0, %v259_v3, 0.0  ;;  %s365_s4 = sshll.u32 %s228_s26, 4  ;;  %s487_s5 = sshll.u32 %s737_s15, 7  ;;  %s971_s4 = int_to_ptr.vmem [resolvable:$true] %s365_s4 }
  0x62   : > { %v233_v9 = vrot.slane %v232_v6, 4  ;;  %v261_v11 = vrot.slane %v260_v10, 4  ;;  %v288_v12 = vsel %vm231_vm0, %v287_v7, 0.0  ;;  %v312_v13 = vsel %vm231_vm0, %v311_v8, 0.0  ;;  %s976_s7 = scalar_lea.hbm %s1026_s3, %s487_s5  ;;  %s350_s8 = scalar_lea.sflag [#allocation4], %s933_s18 }
  0x63   : > { %v289_v15 = vrot.slane %v288_v12, 4  ;;  %v313_v16 = vrot.slane %v312_v13, 4  ;;  %s655_s15 = scalar_lea.vmem %s971_s4, 128  ;;  %s750_s9 = smov [#allocation9]  }
  0x64   : > { %v234_v14 = vadd.f32 %v233_v9, %v232_v6  ;;  %v262_v17 = vadd.f32 %v261_v11, %v260_v10  ;;  %v244_v41 = vstv %s242_s20  ;;  %p656_p1 = scmp.ne.s32.totalorder %s971_s4, %s655_s15  ;;  %s659_s21 = sshll.u32 %s750_s9, 4  ;;  %s660_s21 = int_to_ptr.vmem [resolvable:$false] %s659_s21 }
  0x65   : > { %v290_v19 = vadd.f32 %v289_v15, %v288_v12  ;;  %v314_v20 = vadd.f32 %v313_v16, %v312_v13  ;;  %v272_v44 = vstv %s484_s22  ;;  %s661_s24 = scalar_lea.vmem %s660_s21, 256  ;;  %p662_p9 = scmp.lt.s32.totalorder %s971_s4, %s660_s21 }
  0x66   : > { %v235_v18 = vrot.slane %v234_v14, 2  ;;  %v263_v21 = vrot.slane %v262_v17, 2  ;;  %p657_p4 = pnand %p656_p1, %p876_p8  ;;  %p663_p0 = scmp.lt.s32.totalorder %s661_s24, %s655_s15 }
  0x67   : > { %v291_v23 = vrot.slane %v290_v19, 2  ;;  %v315_v24 = vrot.slane %v314_v20, 2 }
  0x68   : > { %v236_v22 = vadd.f32 %v235_v18, %v234_v14  ;;  %v264_v25 = vadd.f32 %v263_v21, %v262_v17  ;;  %v254_v18 = vstv %s243_s19  ;;  %p658_p6 = pneg %p657_p4  ;;  %p664_p11 = por %p663_p0, %p662_p9 }
  0x69   : > { %v292_v27 = vadd.f32 %v291_v23, %v290_v19  ;;  %v316_v28 = vadd.f32 %v315_v24, %v314_v20 }
  0x6a   : > { %v237_v26 = vrot.slane %v236_v22, 1  ;;  %v265_v29 = vrot.slane %v264_v25, 1  ;;  %p665_p5 = pnand %p664_p11, %p658_p6 }
  0x6b   : > { %v293_v31 = vrot.slane %v292_v27, 1  ;;  %v317_v32 = vrot.slane %v316_v28, 1 }
  0x6c   : > { %v238_v30 = vadd.f32 %v237_v26, %v236_v22  ;;  %v266_v33 = vadd.f32 %v265_v29, %v264_v25  ;;  %v282_v22 = vstv %s485_s25 }
  0x6d   : > { %v294_v35 = vadd.f32 %v293_v31, %v292_v27  ;;  %v318_v36 = vadd.f32 %v317_v32, %v316_v28 }
  0x6e   : > { %v239_v34 = vmax.f32 %v238_v30, 1e-30  ;;  %v267_v37 = vmax.f32 %v266_v33, 1e-30 }
  0x6f   : > { %v295_v38 = vmax.f32 %v294_v35, 1e-30  ;;  %v319_v39 = vmax.f32 %v318_v36, 1e-30 }
  0x70   : > { %573 = vrsqrt.f32 %v239_v34 }
  0x71   : > { %575 = vrsqrt.f32 %v267_v37 }
  0x72   : > { %577 = vrsqrt.f32 %v295_v38 }
  0x73   : > { %579 = vrsqrt.f32 %v319_v39 }
  0x7a   : > { %v574_v40 = vpop.eup %573 }
  0x7b   : > { %v576_v42 = vpop.eup %575  ;;  %v241_v43 = vmul.f32 %v574_v40, %v239_v34 }
  0x7c   : > { %v578_v45 = vpop.eup %577  ;;  %v269_v46 = vmul.f32 %v576_v42, %v267_v37 }
  0x7d   : > { %v580_v47 = vpop.eup %579  ;;  %v245_v48 = vmul.f32 %v244_v41, %v241_v43  ;;  %v297_v49 = vmul.f32 %v578_v45, %v295_v38 }
  0x7e   : > { %v273_v50 = vmul.f32 %v272_v44, %v269_v46  ;;  %v321_v51 = vmul.f32 %v580_v47, %v319_v39 }
  0x7f   : > { %v246_v52 = vmin.f32 %v245_v48, 0.99999  ;;  %v298_v53 = vmul.f32 %v297_v49, %v244_v41 }
  0x80   : > { %v274_v54 = vmin.f32 %v273_v50, 0.99999  ;;  %v322_v55 = vmul.f32 %v321_v51, %v272_v44 }
  0x81   : > { %v248_v56 = vsub.f32 1.0, %v246_v52  ;;  %v299_v57 = vmin.f32 %v298_v53, 0.99999  ;;  %v247_v62 = vadd.f32 1.0, %v246_v52 }
  0x82   : > { %v276_v58 = vsub.f32 1.0, %v274_v54  ;;  %v323_v59 = vmin.f32 %v322_v55, 0.99999  ;;  %v275_v63 = vadd.f32 1.0, %v274_v54 }
  0x83   : > { %581 = vrcp.f32 %v248_v56  ;;  %v301_v60 = vsub.f32 1.0, %v299_v57  ;;  %v300_v1 = vadd.f32 1.0, %v299_v57 }
  0x84   : > { %583 = vrcp.f32 %v276_v58  ;;  %v325_v61 = vsub.f32 1.0, %v323_v59  ;;  %v324_v6 = vadd.f32 1.0, %v323_v59 }
  0x85   : > { %585 = vrcp.f32 %v301_v60 }
  0x86   : > { %587 = vrcp.f32 %v325_v61 }
  0x8d   : > { %v582_v3 = vpop.eup %581 }
  0x8e   : > { %v584_v7 = vpop.eup %583  ;;  %v250_v8 = vmul.f32 %v582_v3, %v247_v62 }
  0x8f   : > { %v586_v9 = vpop.eup %585  ;;  %v278_v10 = vmul.f32 %v584_v7, %v275_v63 }
  0x90   : > { %v588_v11 = vpop.eup %587  ;;  %589 = vlog2.f32 %v250_v8  ;;  %v303_v12 = vmul.f32 %v586_v9, %v300_v1 }
  0x91   : > { %591 = vlog2.f32 %v278_v10  ;;  %v327_v13 = vmul.f32 %v588_v11, %v324_v6 }
  0x92   : > { %593 = vlog2.f32 %v303_v12 }
  0x93   : > { %595 = vlog2.f32 %v327_v13 }
  0x9a   : > { %v590_v14 = vpop.eup %589 }
  0x9b   : > { %v592_v15 = vpop.eup %591  ;;  %v252_v16 = vmul.f32 0.6931472, %v590_v14 }
  0x9c   : > { %v594_v17 = vpop.eup %593  ;;  %v280_v19 = vmul.f32 0.6931472, %v592_v15 }
  0x9d   : > { %v596_v20 = vpop.eup %595  ;;  %v253_v21 = vmul.f32 0.5, %v252_v16  ;;  %v305_v23 = vmul.f32 0.6931472, %v594_v17 }
  0x9e   : > { %v281_v24 = vmul.f32 0.5, %v280_v19  ;;  %v329_v25 = vmul.f32 0.6931472, %v596_v20 }
  0x9f   : > { %v255_v26 = vmul.f32 %v254_v18, %v253_v21  ;;  %v306_v27 = vmul.f32 0.5, %v305_v23 }
  0xa0   : > { %v283_v28 = vmul.f32 %v282_v22, %v281_v24  ;;  %v330_v29 = vmul.f32 0.5, %v329_v25 }
  0xa1   : > { %v256_v30 = vmul.f32 %v574_v40, %v255_v26  ;;  %v307_v31 = vmul.f32 %v306_v27, %v254_v18 }
  0xa2   : > { %v284_v32 = vmul.f32 %v576_v42, %v283_v28  ;;  %v331_v33 = vmul.f32 %v330_v29, %v282_v22 }
  0xa3   : > { %v308_v34 = vmul.f32 %v578_v45, %v307_v31  ;;  %v257_v35 = vmul.f32 %v256_v30, %v943_v0 }
  0xa4   : > { %v285_v36 = vmul.f32 %v284_v32, %v947_v2  ;;  %v332_v37 = vmul.f32 %v580_v47, %v331_v33 }
  0xa5   : > { %v309_v38 = vmul.f32 %v308_v34, %v951_v4 }
  0xa6   : > { %v333_v39 = vmul.f32 %v332_v37, %v953_v5  ;;  %v335_v41 = vrot.slane %v285_v36, 6 }
  0xa7   : > { %v338_v40 = vrot.slane %v309_v38, 4 }
  0xa8   : > { %v341_v42 = vrot.slane %v333_v39, 2  ;;  %v343_v0 = vsel %vm231_vm0, %v257_v35, %v335_v41 }
  0xa9   : > { %v345_v43 = vsel %vm344_vm1, %v343_v0, %v338_v40 }
  0xaa   : > { %v347_v2 = vsel %vm346_vm2, %v345_v43, %v341_v42 }
  0xab   : > { %348 = vst [vmem:[%s228_s26] sm:$0xff] %v347_v2 }
  0xac   : > { %668 = shalt.err (!%p665_p5)
}
  0xad   : > { %s669_s18 = scalar_lea.hbm %s976_s7, 128  ;;  %s673_s20 = scalar_lea.hbm %s1026_s3, 256 }
  0xae   : > { %p670_p10 = scmp.ne.s32.totalorder %s976_s7, %s669_s18  ;;  %p674_p7 = scmp.lt.u32.totalorder %s976_s7, %s1026_s3 }
  0xaf   : > { %p675_p12 = scmp.lt.u32.totalorder %s673_s20, %s669_s18  ;;  %p677_p1 = scmp.lt.u32.totalorder %s669_s18, %s976_s7 }
  0xb0   : > { %p671_p13 = pnand %p670_p10, %p876_p8 }
  0xb1   : > { %p676_p2 = por %p675_p12, %p674_p7 }
  0xb2   : > { %p672_p3 = pneg %p671_p13 }
  0xb3   : > { %p678_p4 = por %p677_p1, %p676_p2 }
  0xb5   : > { %p679_p6 = pnand %p678_p4, %p672_p3 }
  0xb7   : > { %682 = shalt.err (!%p679_p6)
}
  0xb8   : > { %500 = dma.vmem_to_hbm [thread:$0]  (%p876_p8), %s971_s4, 128, %s976_s7, %s350_s8  }
  0xb9 PF: > { %s377_s25 = sand.u32 1, %s725_s12   ;;  %p1043_p9 = scmp.ne.s32.totalorder %s1034_s23, 0 }
  0xba   : > { %p1044_p0 = scmp.ge.s32.totalorder %s745_s17, 2  ;;  %s378_s26 = scalar_lea.sflag [#allocation4], %s377_s25 }
  0xbc   : > { %p514_p11 = pnand %p1044_p0, %p1043_p9 }
  0xbe   : > { %720 = dma.done.wait (!%p514_p11), %s378_s26, 128  }
  0xbf   : > { %722 = vsyncadd (!%p514_p11), %s378_s26, 4294967168  ;;  %s21_s17 = sadd.s32 1, %s745_s17   ;;  %s1045_s12 = smov %s729_s13 }
  0xc0   : > { %p18_p5 = scmp.ge.s32.totalorder %s21_s17, 4   ;;  %s1046_s13 = smov %s733_s14 }
  0xc1   : > { %s1047_s14 = smov %s882_s6  ;;  %s1048_s15 = smov %s741_s16 }
  0xc2   : > { %s1049_s16 = smov %s1051_s29  ;;  %20 = sbr.rel (!%p18_p5) target bundleno = 8 (0x8), region = 87 }
  0xc9   :  { %383 = vsyncpa [#allocation3], 1 }
  0xca   :  { %385 = vsyncpa [#allocation3 + $0x1], 1 }
  0xcb   :  { %386 = vsyncpa [#allocation4], 1 }
  0xcc   :  { %388 = vsyncpa [#allocation4 + $0x1], 1 }
  0xcd   :  { %389 = vsyncpa [#allocation5], 1 }
  0xce   :  { %391 = vsyncpa [#allocation5 + $0x1], 1 }
  0xcf   :  { %392 = vsyncpa [#allocation6], 1 }
  0xd0   :  { %394 = vsyncpa [#allocation6 + $0x1], 1 }

</bundles_post_ra>
